<compile_context>
chip_gen: v5e
topology: v5e:2x2
jax: 0.10.0
libtpu: 0.0.40
codegen_flags: <defaults>
</compile_context>

<pallas_src>
import math
import functools

import jax
import jax.numpy as jnp
from jax import lax
from jax.experimental import pallas as pl
from jax.experimental.pallas import tpu as pltpu


DEFAULT_ROWS_PER_BLOCK = 256      # tokens gathered per grid step
DMA_RING_DEPTH = 8                # concurrent row DMAs (HBM-gather path)


def _round_up(x, m):
    return ((x + m - 1) // m) * m


def _min_sublanes(dtype):
    # Native sublane packing: 8 rows for 32-bit, 16 for 16-bit, 32 for 8-bit.
    return 8 * (4 // jnp.dtype(dtype).itemsize)


# --------------------------------------------------------------------------
# Path A: small 32-bit table resident in VMEM, in-kernel row gather.
# --------------------------------------------------------------------------
def _vmem_table_kernel(ids_ref, table_ref, out_ref, *, scale, rows_per_block):
    # ids_ref:   (n_pad,) int32 in SMEM (scalar-prefetched token ids)
    # table_ref: (V, D) embedding table, resident in VMEM
    # out_ref:   (rows_per_block, D) resident output block
    base = pl.program_id(0) * rows_per_block
    scale_f = jnp.float32(scale)

    def body(r, carry):
        tok = ids_ref[base + r]
        row = table_ref[pl.ds(tok, 1), :].astype(jnp.float32) * scale_f
        out_ref[pl.ds(r, 1), :] = row.astype(out_ref.dtype)
        return carry

    lax.fori_loop(0, rows_per_block, body, 0)


# --------------------------------------------------------------------------
# Path B: table stays in HBM, manual multi-DMA row gather into the output
# block, then one dense scale over the whole slab.
# --------------------------------------------------------------------------
def _hbm_gather_kernel(ids_ref, table_ref, out_ref, copy_sems, *,
                       scale, rows_per_block, dma_depth):
    base = pl.program_id(0) * rows_per_block

    def start_one(r, carry):
        tok = ids_ref[base + r]
        pltpu.make_async_copy(
            table_ref.at[pl.ds(tok, 1), :],
            out_ref.at[pl.ds(r, 1), :],
            copy_sems.at[r % dma_depth]).start()
        return carry

    lax.fori_loop(0, rows_per_block, start_one, 0)

    def wait_one(r, carry):
        # Size-matched descriptor; only the byte count matters for the wait.
        pltpu.make_async_copy(
            table_ref.at[pl.ds(0, 1), :],
            out_ref.at[pl.ds(r, 1), :],
            copy_sems.at[r % dma_depth]).wait()
        return carry

    lax.fori_loop(0, rows_per_block, wait_one, 0)

    # One dense VPU multiply for the whole (rows_per_block, D) slab.
    out_ref[...] = (out_ref[...].astype(jnp.float32)
                    * jnp.float32(scale)).astype(out_ref.dtype)


# --------------------------------------------------------------------------
# Wrapper
# --------------------------------------------------------------------------
def _embed_chunk(ids_chunk, emb_table, *, rows_per_block, scale,
                 use_vmem_table, dma_depth=DMA_RING_DEPTH):
    n = ids_chunk.shape[0]
    V, D = emb_table.shape
    n_blocks = pl.cdiv(n, rows_per_block)
    n_pad = n_blocks * rows_per_block
    if n_pad != n:
        # Only the tiny id vector is padded; the (n, D) output never is --
        # Pallas drops the out-of-bounds sublanes of the last block on writeback.
        ids_chunk = jnp.pad(ids_chunk, (0, n_pad - n))

    out_shape = jax.ShapeDtypeStruct((n, D), emb_table.dtype)

    if use_vmem_table:
        grid_spec = pltpu.PrefetchScalarGridSpec(
            num_scalar_prefetch=1,
            grid=(n_blocks,),
            in_specs=[
                # Whole table in VMEM, same block index every step -> DMA'd once.
                pl.BlockSpec((V, D), lambda b, ids: (0, 0)),
            ],
            out_specs=pl.BlockSpec((rows_per_block, D), lambda b, ids: (b, 0)),
        )
        kernel = functools.partial(_vmem_table_kernel, scale=scale,
                                   rows_per_block=rows_per_block)
    else:
        grid_spec = pltpu.PrefetchScalarGridSpec(
            num_scalar_prefetch=1,
            grid=(n_blocks,),
            in_specs=[
                # Table stays in HBM; rows gathered via manual DMA.
                pl.BlockSpec(memory_space=pl.ANY),
            ],
            out_specs=pl.BlockSpec((rows_per_block, D), lambda b, ids: (b, 0)),
            scratch_shapes=[pltpu.SemaphoreType.DMA((dma_depth,))],
        )
        kernel = functools.partial(_hbm_gather_kernel, scale=scale,
                                   rows_per_block=rows_per_block,
                                   dma_depth=dma_depth)

    return pl.pallas_call(
        kernel,
        out_shape=out_shape,
        grid_spec=grid_spec,
        compiler_params=pltpu.CompilerParams(
            dimension_semantics=("parallel",)),
    )(ids_chunk, emb_table)


def token_embeddings(ids, emb_table, *, rows_per_block=None,
                     vmem_table_budget_bytes=8 << 20,
                     max_tokens_per_call=16384):
    """ids: int array of any shape; emb_table: (V, D) -> ids.shape + (D,)."""
    V, D = emb_table.shape
    scale = math.sqrt(D)
    n = 1
    for s in ids.shape:
        n *= s

    # Clip guards the gather against out-of-range ids (nn.Embedding would
    # raise instead of reading garbage).
    ids_flat = jnp.clip(ids.reshape(n).astype(jnp.int32), 0, V - 1)

    min_sub = _min_sublanes(emb_table.dtype)
    if rows_per_block is None:
        rows_per_block = min(DEFAULT_ROWS_PER_BLOCK, _round_up(n, min_sub))
    rows_per_block = _round_up(rows_per_block, min_sub)

    itemsize = jnp.dtype(emb_table.dtype).itemsize
    table_bytes = V * D * itemsize
    # VMEM-resident fast path only for 32-bit tables that comfortably fit the
    # scoped VMEM budget (x2 for double buffering still well under 32 MiB).
    use_vmem_table = (itemsize == 4) and (table_bytes <= vmem_table_budget_bytes)

    # Chunk huge token counts so the scalar-prefetched id vector stays small
    # in SMEM (1-D SMEM pads to next_pow2(4*N) bytes).
    chunk = max(rows_per_block,
                (max_tokens_per_call // rows_per_block) * rows_per_block)
    pieces = []
    for start in range(0, n, chunk):
        pieces.append(_embed_chunk(ids_flat[start:start + chunk], emb_table,
                                   rows_per_block=rows_per_block, scale=scale,
                                   use_vmem_table=use_vmem_table))
    out = pieces[0] if len(pieces) == 1 else jnp.concatenate(pieces, axis=0)
    return out.reshape(*ids.shape, D)


def token_embeddings_ref(ids, emb_table):
    D = emb_table.shape[1]
    return (emb_table[ids].astype(jnp.float32)
            * jnp.float32(math.sqrt(D))).astype(emb_table.dtype)


if __name__ == "__main__":
    key = jax.random.PRNGKey(0)

    # Case 1: small f32 table -> VMEM-resident-table path.
    vocab, D, B, S = 64, 128, 2, 8
    k1, k2, key = jax.random.split(key, 3)
    table = jax.random.normal(k1, (vocab, D), dtype=jnp.float32)  # nn.Embedding init ~ N(0,1)
    ids = jax.random.randint(k2, (B, S), 0, vocab, dtype=jnp.int32)
    out = jax.block_until_ready(token_embeddings(ids, table))
    ref = token_embeddings_ref(ids, table)
    assert out.shape == (B, S, D) and out.dtype == jnp.float32
    assert jnp.allclose(out, ref, atol=1e-5, rtol=1e-5)

    # Case 2: force the HBM DMA-gather path + partial final block (n=21 not a
    # multiple of the 24-row block) to exercise masked writeback.
    vocab2, D2, B2, S2 = 512, 256, 3, 7
    k1, k2, key = jax.random.split(key, 3)
    table2 = jax.random.normal(k1, (vocab2, D2), dtype=jnp.float32)
    ids2 = jax.random.randint(k2, (B2, S2), 0, vocab2, dtype=jnp.int32)
    out2 = jax.block_until_ready(
        token_embeddings(ids2, table2, vmem_table_budget_bytes=0))
    ref2 = token_embeddings_ref(ids2, table2)
    assert out2.shape == (B2, S2, D2)
    assert jnp.allclose(out2, ref2, atol=1e-5, rtol=1e-5)

    # Case 3: bf16 table (16-row native packing) -> routed to the DMA-gather
    # path automatically; dense slab scale keeps stores unmasked.
    table3 = table2.astype(jnp.bfloat16)
    out3 = jax.block_until_ready(token_embeddings(ids2, table3))
    ref3 = token_embeddings_ref(ids2, table3)
    assert out3.dtype == jnp.bfloat16
    assert jnp.allclose(out3.astype(jnp.float32), ref3.astype(jnp.float32),
                        atol=1e-2, rtol=1e-2)

    print("KERNEL_OK")
</pallas_src>

<mosaic_0001>
module attributes {stable_mosaic.version = 11 : i64} {
  func.func @_vmem_table_kernel(%arg0: i32, %arg1: memref<16xi32, #tpu.memory_space<smem>>, %arg2: memref<64x128xf32, #tpu.memory_space<vmem>>, %arg3: memref<16x128xf32, #tpu.memory_space<vmem>>) attributes {dimension_semantics = [#tpu.dimension_semantics<parallel>], iteration_bounds = array<i64: 1>, scalar_prefetch = 1 : i64, scratch_operands = 0 : i64, tpu.core_type = #tpu.core_type<tc>, window_params = [{pipeline_mode = #tpu.pipeline_mode<synchronous>, transform_indices = @transform_0, window_bounds = array<i64: 64, 128>}, {transform_indices = @transform_1, window_bounds = array<i64: 16, 128>}]} {
    %c16_i32 = arith.constant 16 : i32
    %0 = arith.muli %arg0, %c16_i32 : i32
    %cst = arith.constant 11.3137083 : f32
    %c0_i32 = arith.constant 0 : i32
    %c16_i32_0 = arith.constant 16 : i32
    %1 = arith.addi %c0_i32, %c16_i32_0 : i32
    %c1_i32 = arith.constant 1 : i32
    scf.for %arg4 = %c0_i32 to %1 step %c1_i32  : i32 {
      %2 = arith.addi %0, %arg4 : i32
      %3 = arith.index_cast %2 : i32 to index
      %4 = memref.load %arg1[%3] : memref<16xi32, #tpu.memory_space<smem>>
      %5 = arith.index_cast %4 : i32 to index
      %c0 = arith.constant 0 : index
      %6 = vector.load %arg2[%5, %c0] : memref<64x128xf32, #tpu.memory_space<vmem>>, vector<1x128xf32>
      %7 = vector.broadcast %cst : f32 to vector<1x128xf32>
      %8 = arith.mulf %6, %7 : vector<1x128xf32>
      %9 = arith.index_cast %arg4 : i32 to index
      %c0_2 = arith.constant 0 : index
      %10 = vector.load %arg3[%9, %c0_2] : memref<16x128xf32, #tpu.memory_space<vmem>>, vector<1x128xf32>
      tpu.vector_store %arg3[%9, %c0_2], %8 {strides = array<i32>} : memref<16x128xf32, #tpu.memory_space<vmem>>, vector<1x128xf32>,
    }
    %c16_i32_1 = arith.constant 16 : i32
    return
  }
  func.func @transform_0(%arg0: i32, %arg1: memref<16xi32, #tpu.memory_space<smem>>) -> (i32, i32) {
    %c0_i32 = arith.constant 0 : i32
    %c0_i32_0 = arith.constant 0 : i32
    %c0_i32_1 = arith.constant 0 : i32
    return %c0_i32, %c0_i32_0 : i32, i32
  }
  func.func @transform_1(%arg0: i32, %arg1: memref<16xi32, #tpu.memory_space<smem>>) -> (i32, i32) {
    %c0_i32 = arith.constant 0 : i32
    %c0_i32_0 = arith.constant 0 : i32
    return %arg0, %c0_i32 : i32, i32
  }
}

</mosaic_0001>

<bundles_post_ra>
// kernel: tpu_custom_call.1
= control target key start
LH: loop header
LB: loop body
LE: loop exit
PB: predicated region body
PF: predicated region fallthrough
CT: control target
= control target key end

     0   :  { %s161_s12 = smov [#allocation3]   ;;  %s190_s0 = inlined_call_operand.hbm [shape: s32[16], index: 0, kind: input, shape index: {}]   ;;  %s191_s1 = inlined_call_operand.hbm [shape: f32[64,128], index: 1, kind: input, shape index: {}]   ;;  %s192_s2 = inlined_call_operand.hbm [shape: f32[16,128], index: 2, kind: output, shape index: {}]  }
   0x1   :  { %s8_s11 = sshll.u32 %s190_s0, 4  ;;  %s9_s11 = int_to_ptr.hbm [resolvable:$true] %s8_s11 }
   0x2   :  { %11 = dma.hbm_to_smem %s9_s11, 16, %s161_s12, [#allocation2] }
   0x3   :  { %151 = dma.done.wait [#allocation2], 16 }
   0x4   :  { %152 = vsyncadd [#allocation2], 4294967280 }
   0x5   :  { %14 = sfence }
   0x6   :  { %15 = vsyncpa [#allocation5], 0 }
   0x7   :  { %16 = vsyncpa [#allocation6], 0  ;;  %s21_s15 = sshll.u32 %s191_s1, 4  ;;  %s162_s16 = smov [#allocation4]   ;;  %s22_s15 = int_to_ptr.hbm [resolvable:$true] %s21_s15 }
   0x8   :  { %s23_s17 = sshll.u32 %s162_s16, 4  ;;  %s163_s18 = smov 128   ;;  %s24_s17 = int_to_ptr.vmem [resolvable:$true] %s23_s17 }
   0x9   :  { %s164_s19 = smov 8  }
   0xa   :  { %29 = dma.hbm_to_vmem [thread:$0]  %s22_s15, 1024, %s24_s17, [#allocation5], %s163_s18, %s163_s18, %s164_s19  }
   0xb   :  { %153 = dma.done.wait [#allocation5], 1024  }
   0xc   :  { %154 = vsyncadd [#allocation5], 4294966272  ;;  %s157_s0 = smov 0  }
   0xd LB: > { %s42_s20 = sld [smem:[#allocation3 + %s159_s0]]  ;;  %s46_s22 = scalar_lea.vmem [#allocation7], %s159_s0  ;;  %s159_s0 = sphi %s157_s0, %s40_s0  }
   0xe   : > { %s40_s0 = sadd.s32 1, %s159_s0  }
   0xf   : > { %p37_p0 = scmp.ge.s32.totalorder %s40_s0, 16  }
  0x10   :  { %s54_s24 = sshll.u32 (%p37_p0), %s192_s2, 4  ;;  %s165_s25 = smov (%p37_p0), [#allocation7]   ;;  %s55_s24 = int_to_ptr.hbm [resolvable:$true] %s54_s24 }
  0x11   :  { %s52_s26 = sshll.u32 (%p37_p0), %s165_s25, 4  ;;  %s53_s26 = int_to_ptr.vmem [resolvable:$true] %s52_s26 }
  0x13   : > { %s43_s21 = scalar_lea.vmem [#allocation4], %s42_s20  ;;  %39 = sbr.rel (!%p37_p0) target bundleno = 13 (0xd), region = 37 }
  0x14   : > { %v44_v0 = vld [vmem:[%s43_s21] sm:$0x1] }
  0x15   : > { %v45_v1 = vmul.f32 11.313708, %v44_v0 }
  0x17   : > { %47 = vst [vmem:[%s46_s22] sm:$0x1] %v45_v1 }
  0x18   :  { %60 = dma.vmem_to_hbm [thread:$0]  %s53_s26, 256, %s55_s24, [#allocation6], %s163_s18, %s163_s18, %s164_s19  }
  0x19   :  { %155 = dma.done.wait [#allocation6], 256  }
  0x1a   :  { %156 = vsyncadd [#allocation6], 4294967040 }
  0x1b   :  { %65 = vsyncpa [#allocation5], 1 }
  0x1c   :  { %66 = vsyncpa [#allocation6], 1 }

</bundles_post_ra>
